<compile_context>
chip_gen: v6e
topology: v6e:2x2x1
jax: 0.10.0
libtpu: 0.0.40
codegen_flags: <defaults>
</compile_context>

<pallas_src>
import math
from functools import partial

import jax
import jax.numpy as jnp
from jax.experimental import pallas as pl
from jax.experimental.pallas import tpu as pltpu

LANES = 128


# ----------------------------- small helpers --------------------------------

def _vmem_capacity_bytes():
    """Best-effort per-core VMEM capacity (v5e/v6e: 128 MiB, v7x: 64 MiB)."""
    try:
        return int(pltpu.get_tpu_info().vmem_capacity_bytes)
    except Exception:
        return 64 * 1024 * 1024  # conservative (v7x-sized) fallback


def _round_up(x, m):
    return ((x + m - 1) // m) * m


def _cout_pad(cout):
    # Don't pad small channel counts to 128 lanes: a block whose last dim equals the full
    # array dim is legal (lane-masked stores), and the HBM-traffic saving dominates in the
    # mem-bound regime.  Large Cout is rounded up for lane-dense unmasked stores.
    return cout if cout <= 64 else _round_up(cout, LANES)


def _pick_tm(m, k, cpad):
    """Largest row tile whose double-buffered footprint (incl. implicit f32 temporaries)
    fits ~40% of the local chip's VMEM; shrunk for small problems."""
    budget = int(0.4 * _vmem_capacity_bytes())
    tm = 128
    for cand in (2048, 1024, 512, 256, 128):
        footprint = (2 * cand * k * 2        # patches tile, double-buffered, bf16
                     + 2 * k * cpad * 2      # weight block (counted 2x: default double buffer)
                     + 2 * cand * cpad * 4   # output tile, double-buffered, worst-case f32
                     + 2 * cand * cpad * 4   # implicit f32 matmul result + y*y temporaries
                     + 2 * 8 * cpad * 4)     # stats tile
        if footprint <= budget:
            tm = cand
            break
    while tm > 128 and m <= tm // 2:
        tm //= 2
    return tm


# ----------------------------- Pallas kernels -------------------------------

def fused_small_kernel(p_ref, w_ref, g_ref, b_ref, o_ref, *, count, eps):
    """Fast path (whole problem resident in VMEM): conv matmul + batch stats + BN + ReLU."""
    y = jnp.dot(p_ref[...], w_ref[...], preferred_element_type=jnp.float32)
    mean = jnp.sum(y, axis=0, keepdims=True) / count
    var = jnp.maximum(jnp.sum(y * y, axis=0, keepdims=True) / count - mean * mean, 0.0)
    scale = g_ref[...] * jax.lax.rsqrt(var + eps)
    shift = b_ref[...] - mean * scale
    o_ref[...] = jnp.maximum(y * scale + shift, 0.0)


def _stats_rows(y, cpad):
    """(8, Cpad) tile: row 0 = per-channel sum, row 1 = per-channel sum of squares, rest 0.
    Built once so it can be written with a single store."""
    ssum = jnp.sum(y, axis=0, keepdims=True)
    ssq = jnp.sum(y * y, axis=0, keepdims=True)
    row = jax.lax.broadcasted_iota(jnp.int32, (8, cpad), 0)
    return jnp.where(row == 0, ssum, jnp.where(row == 1, ssq, 0.0))


def conv_stats_kernel(p_ref, w_ref, y_ref, stats_ref):
    """Large-K path, pass 1: conv matmul tile -> bf16 y + per-tile batch-stat partials."""
    y = jnp.dot(p_ref[...], w_ref[...], preferred_element_type=jnp.float32)
    y_ref[...] = y.astype(y_ref.dtype)
    stats_ref[...] = _stats_rows(y, stats_ref.shape[1])


def stats_only_kernel(p_ref, w_ref, stats_ref):
    """Small-K path, pass 1: per-tile batch-stat partials only (y never written to HBM)."""
    y = jnp.dot(p_ref[...], w_ref[...], preferred_element_type=jnp.float32)
    stats_ref[...] = _stats_rows(y, stats_ref.shape[1])


def matmul_bn_relu_kernel(p_ref, w_ref, scale_ref, shift_ref, o_ref):
    """Small-K path, pass 2: recompute the conv matmul fused with BN + ReLU (f32 out)."""
    y = jnp.dot(p_ref[...], w_ref[...], preferred_element_type=jnp.float32)
    o_ref[...] = jnp.maximum(y * scale_ref[...] + shift_ref[...], 0.0)


def bn_relu_kernel(y_ref, scale_ref, shift_ref, o_ref):
    """Large-K path, pass 2: folded BN (scale/shift) + ReLU over a bf16 y tile (f32 out)."""
    y = y_ref[...].astype(jnp.float32)
    o_ref[...] = jnp.maximum(y * scale_ref[...] + shift_ref[...], 0.0)


# ------------------------------- Wrapper ------------------------------------

@partial(jax.jit, static_argnames=("stride", "padding", "eps", "tile_m"))
def basic_conv2d(x_nchw, weight, gamma, beta, *, stride, padding, eps=1e-3, tile_m=None):
    """Forward pass of BasicConv2d. x_nchw: (N, Cin, H, W); weight: (Cout, Cin, KH, KW)."""
    N, Cin, H, W = x_nchw.shape
    Cout, _, KH, KW = weight.shape
    Cpad = _cout_pad(Cout)

    # ---- glue (XLA): NCHW -> NHWC bf16, pad, im2col -> (M, K) patches ----
    # TODO(synk): fold this im2col into the Pallas kernels (manual halo DMA over the padded
    # NHWC input) to remove the KH*KW x HBM traffic blow-up of the materialized patches.
    x = jnp.transpose(x_nchw, (0, 2, 3, 1)).astype(jnp.bfloat16)
    xp = jnp.pad(x, ((0, 0), (padding, padding), (padding, padding), (0, 0)))
    OH = (H + 2 * padding - KH) // stride + 1
    OW = (W + 2 * padding - KW) // stride + 1
    cols = []
    for kh in range(KH):
        for kw in range(KW):
            cols.append(xp[:, kh:kh + stride * OH:stride, kw:kw + stride * OW:stride, :])
    patches = jnp.stack(cols, axis=3).reshape(N * OH * OW, KH * KW * Cin)   # (M, K) bf16
    M, K = patches.shape

    # weight[co, ci, kh, kw] -> (kh, kw, ci, co) -> (K, Cout), zero-padded to Cpad channels.
    w2 = jnp.transpose(weight, (2, 3, 1, 0)).reshape(K, Cout)
    w2 = jnp.pad(w2, ((0, 0), (0, Cpad - Cout))).astype(jnp.bfloat16)
    g_pad = jnp.zeros((1, Cpad), jnp.float32).at[0, :Cout].set(gamma.astype(jnp.float32))
    b_pad = jnp.zeros((1, Cpad), jnp.float32).at[0, :Cout].set(beta.astype(jnp.float32))

    cap = _vmem_capacity_bytes()
    count = float(M)

    # ---- fast path: whole problem resident in VMEM -> one fused kernel, no HBM round trip ----
    fast_bytes = (M * K * 2 + K * Cpad * 2 + M * Cpad * 4        # patches + weights + out
                  + 2 * M * Cpad * 4 + 4 * Cpad * 4)             # f32 temporaries + BN params
    if tile_m is None and fast_bytes <= int(0.35 * cap):
        out = pl.pallas_call(
            partial(fused_small_kernel, count=count, eps=eps),
            out_shape=jax.ShapeDtypeStruct((M, Cpad), jnp.float32),
            compiler_params=pltpu.CompilerParams(
                vmem_limit_bytes=int(min(0.9 * cap, max(4 * fast_bytes, 32 << 20)))),
        )(patches, w2, g_pad, b_pad)
        out = out[:, :Cout].reshape(N, OH, OW, Cout)
        return jnp.transpose(out, (0, 3, 1, 2))

    # ---- general (tiled) path ----
    TM = tile_m if tile_m is not None else _pick_tm(M, K, Cpad)
    G = -(-M // TM)                     # ceil-div: number of row tiles
    M_pad = G * TM
    if M_pad > M:
        # Zero rows give zero conv output -> no effect on sum / sum-of-squares; count uses M.
        patches = jnp.pad(patches, ((0, M_pad - M), (0, 0)))

    footprint = (2 * TM * K * 2 + 2 * K * Cpad * 2 + 2 * TM * Cpad * 4
                 + 2 * TM * Cpad * 4 + 2 * 8 * Cpad * 4)
    cparams = pltpu.CompilerParams(
        dimension_semantics=("parallel",),   # per-tile stat partials -> megacore-shardable
        vmem_limit_bytes=int(min(0.9 * cap, max(2 * footprint, 32 << 20))))

    p_spec = pl.BlockSpec((TM, K), lambda i: (i, 0))
    w_spec = pl.BlockSpec((K, Cpad), lambda i: (0, 0))
    row_spec = pl.BlockSpec((1, Cpad), lambda i: (0, 0))
    o_spec = pl.BlockSpec((TM, Cpad), lambda i: (i, 0))
    s_spec = pl.BlockSpec((8, Cpad), lambda i: (i, 0))

    # Re-reading patches in pass 2 costs M*K*2 bytes; a bf16 y round trip costs 2*M*Cpad*2.
    recompute = K <= 2 * Cpad

    if recompute:
        stats = pl.pallas_call(
            stats_only_kernel,
            out_shape=jax.ShapeDtypeStruct((G * 8, Cpad), jnp.float32),
            grid_spec=pltpu.PrefetchScalarGridSpec(
                num_scalar_prefetch=0, grid=(G,),
                in_specs=[p_spec, w_spec], out_specs=s_spec),
            compiler_params=cparams,
        )(patches, w2)
        y = None
    else:
        y, stats = pl.pallas_call(
            conv_stats_kernel,
            out_shape=(jax.ShapeDtypeStruct((M_pad, Cpad), jnp.bfloat16),
                       jax.ShapeDtypeStruct((G * 8, Cpad), jnp.float32)),
            grid_spec=pltpu.PrefetchScalarGridSpec(
                num_scalar_prefetch=0, grid=(G,),
                in_specs=[p_spec, w_spec], out_specs=(o_spec, s_spec)),
            compiler_params=cparams,
        )(patches, w2)

    # ---- glue (XLA): reduce partials, fold BN (training batch stats, biased var, eps) ----
    stats = stats.reshape(G, 8, Cpad)
    mean = jnp.sum(stats[:, 0, :], axis=0) / count
    var = jnp.maximum(jnp.sum(stats[:, 1, :], axis=0) / count - mean * mean, 0.0)
    scale = g_pad[0] * jax.lax.rsqrt(var + eps)
    shift = b_pad[0] - mean * scale
    scale2 = scale.reshape(1, Cpad)
    shift2 = shift.reshape(1, Cpad)

    if recompute:
        out = pl.pallas_call(
            matmul_bn_relu_kernel,
            out_shape=jax.ShapeDtypeStruct((M_pad, Cpad), jnp.float32),
            grid_spec=pltpu.PrefetchScalarGridSpec(
                num_scalar_prefetch=0, grid=(G,),
                in_specs=[p_spec, w_spec, row_spec, row_spec], out_specs=o_spec),
            compiler_params=cparams,
        )(patches, w2, scale2, shift2)
    else:
        out = pl.pallas_call(
            bn_relu_kernel,
            out_shape=jax.ShapeDtypeStruct((M_pad, Cpad), jnp.float32),
            grid_spec=pltpu.PrefetchScalarGridSpec(
                num_scalar_prefetch=0, grid=(G,),
                in_specs=[o_spec, row_spec, row_spec], out_specs=o_spec),
            compiler_params=cparams,
        )(y, scale2, shift2)

    out = out[:M, :Cout].reshape(N, OH, OW, Cout)
    return jnp.transpose(out, (0, 3, 1, 2))


# ------------------------------- Reference ----------------------------------

def reference_basic_conv2d(x_nchw, weight, gamma, beta, *, stride, padding, eps=1e-3):
    y = jax.lax.conv_general_dilated(
        x_nchw.astype(jnp.float32), weight.astype(jnp.float32),
        window_strides=(stride, stride),
        padding=[(padding, padding), (padding, padding)],
        dimension_numbers=("NCHW", "OIHW", "NCHW"))
    mean = jnp.mean(y, axis=(0, 2, 3), keepdims=True)
    var = jnp.mean((y - mean) ** 2, axis=(0, 2, 3), keepdims=True)
    yn = (y - mean) / jnp.sqrt(var + eps)
    yn = yn * gamma.reshape(1, -1, 1, 1) + beta.reshape(1, -1, 1, 1)
    return jnp.maximum(yn, 0.0)


def _make_params(kw, kg, kb, cin, cout, ksize):
    fan_in = cin * ksize * ksize
    bound = math.sqrt(2.0) * math.sqrt(3.0 / fan_in)   # kaiming_uniform_-like
    w = jax.random.uniform(kw, (cout, cin, ksize, ksize), jnp.float32, -bound, bound)
    g = 1.0 + 0.1 * jax.random.uniform(kg, (cout,), jnp.float32)   # exercise the affine path
    b = 0.1 * jax.random.normal(kb, (cout,), jnp.float32)
    return w, g, b


# --------------------------------- Main --------------------------------------

if __name__ == "__main__":
    key = jax.random.PRNGKey(0)

    # (name, N, Cin, H(=W), Cout, ksize, stride, padding, tile_m)
    cases = [
        ("fast-path 3x3",           2,  4, 16,  8, 3, 1, 1, None),
        ("general y-path 3x3",      2,  4, 16,  8, 3, 1, 1, 128),
        ("general recompute 1x1",   2, 32,  8, 16, 1, 1, 0, 64),
        ("fast-path strided 3x3",   2,  4, 16,  8, 3, 2, 1, None),
        ("fast-path wide-Cout 1x1", 1,  8,  8, 96, 1, 1, 0, None),
    ]

    for name, N, Cin, H, Cout, ks, st, pad, tile_m in cases:
        key, kx, kw, kg, kb = jax.random.split(key, 5)
        x = jax.random.normal(kx, (N, Cin, H, H), dtype=jnp.float32)
        w, g, b = _make_params(kw, kg, kb, Cin, Cout, ks)

        out = basic_conv2d(x, w, g, b, stride=st, padding=pad, eps=1e-3, tile_m=tile_m)
        out = jax.block_until_ready(out)

        ref = reference_basic_conv2d(x, w, g, b, stride=st, padding=pad, eps=1e-3)
        assert out.shape == ref.shape, f"shape mismatch: {name}"
        assert jnp.allclose(out, ref, rtol=3e-2, atol=3e-2), f"mismatch vs reference: {name}"

    print("KERNEL_OK")
</pallas_src>

<mosaic_0001>
module attributes {stable_mosaic.version = 11 : i64} {
  func.func @fused_small_kernel(%arg0: memref<512x36xbf16, #tpu.memory_space<vmem>>, %arg1: memref<36x8xbf16, #tpu.memory_space<vmem>>, %arg2: memref<1x8xf32, #tpu.memory_space<vmem>>, %arg3: memref<1x8xf32, #tpu.memory_space<vmem>>, %arg4: memref<512x8xf32, #tpu.memory_space<vmem>>) attributes {dimension_semantics = [], scalar_prefetch = 0 : i64, scratch_operands = 0 : i64, tpu.core_type = #tpu.core_type<tc>} {
    %c0 = arith.constant 0 : index
    %c0_0 = arith.constant 0 : index
    %0 = vector.load %arg0[%c0, %c0_0] : memref<512x36xbf16, #tpu.memory_space<vmem>>, vector<512x36xbf16>
    %c0_1 = arith.constant 0 : index
    %c0_2 = arith.constant 0 : index
    %1 = vector.load %arg1[%c0_1, %c0_2] : memref<36x8xbf16, #tpu.memory_space<vmem>>, vector<36x8xbf16>
    %cst = arith.constant dense<0.000000e+00> : vector<512x8xf32>
    %2 = tpu.matmul %0, %1, %cst {dimension_numbers = #tpu.dot_dimension_numbers<[1], [0], [0], [1], [0, 0, 1, 1], [], []>} : vector<512x36xbf16>, vector<36x8xbf16>, vector<512x8xf32> -> vector<512x8xf32>
    %cst_3 = arith.constant dense<0.000000e+00> : vector<8xf32>
    %3 = vector.multi_reduction <add>, %2, %cst_3 [0] : vector<512x8xf32> to vector<8xf32>
    %4 = vector.shape_cast %3 : vector<8xf32> to vector<1x8xf32>
    %cst_4 = arith.constant 5.120000e+02 : f32
    %5 = vector.broadcast %cst_4 : f32 to vector<1x8xf32>
    %6 = arith.divf %4, %5 : vector<1x8xf32>
    %7 = arith.mulf %2, %2 : vector<512x8xf32>
    %cst_5 = arith.constant dense<0.000000e+00> : vector<8xf32>
    %8 = vector.multi_reduction <add>, %7, %cst_5 [0] : vector<512x8xf32> to vector<8xf32>
    %9 = vector.shape_cast %8 : vector<8xf32> to vector<1x8xf32>
    %cst_6 = arith.constant 5.120000e+02 : f32
    %10 = vector.broadcast %cst_6 : f32 to vector<1x8xf32>
    %11 = arith.divf %9, %10 : vector<1x8xf32>
    %12 = arith.mulf %6, %6 : vector<1x8xf32>
    %13 = arith.subf %11, %12 : vector<1x8xf32>
    %cst_7 = arith.constant 0.000000e+00 : f32
    %14 = vector.broadcast %cst_7 : f32 to vector<1x8xf32>
    %15 = arith.maximumf %13, %14 : vector<1x8xf32>
    %c0_8 = arith.constant 0 : index
    %c0_9 = arith.constant 0 : index
    %16 = vector.load %arg2[%c0_8, %c0_9] : memref<1x8xf32, #tpu.memory_space<vmem>>, vector<1x8xf32>
    %cst_10 = arith.constant 1.000000e-03 : f32
    %17 = vector.broadcast %cst_10 : f32 to vector<1x8xf32>
    %18 = arith.addf %15, %17 : vector<1x8xf32>
    %19 = math.rsqrt %18 : vector<1x8xf32>
    %20 = arith.mulf %16, %19 : vector<1x8xf32>
    %c0_11 = arith.constant 0 : index
    %c0_12 = arith.constant 0 : index
    %21 = vector.load %arg3[%c0_11, %c0_12] : memref<1x8xf32, #tpu.memory_space<vmem>>, vector<1x8xf32>
    %22 = arith.mulf %6, %20 : vector<1x8xf32>
    %23 = arith.subf %21, %22 : vector<1x8xf32>
    %24 = vector.broadcast %20 : vector<1x8xf32> to vector<512x8xf32>
    %25 = arith.mulf %2, %24 : vector<512x8xf32>
    %26 = vector.broadcast %23 : vector<1x8xf32> to vector<512x8xf32>
    %27 = arith.addf %25, %26 : vector<512x8xf32>
    %cst_13 = arith.constant 0.000000e+00 : f32
    %28 = vector.broadcast %cst_13 : f32 to vector<512x8xf32>
    %29 = arith.maximumf %27, %28 : vector<512x8xf32>
    %c0_14 = arith.constant 0 : index
    %c0_15 = arith.constant 0 : index
    %30 = vector.load %arg4[%c0_14, %c0_15] : memref<512x8xf32, #tpu.memory_space<vmem>>, vector<512x8xf32>
    tpu.vector_store %arg4[%c0_14, %c0_15], %29 {strides = array<i32>} : memref<512x8xf32, #tpu.memory_space<vmem>>, vector<512x8xf32>,
    return
  }
}

</mosaic_0001>

<bundles_post_ra>
// kernel: basic_conv2d.1
= control target key start
LH: loop header
LB: loop body
LE: loop exit
PB: predicated region body
PF: predicated region fallthrough
CT: control target
= control target key end

     0   :  { %vm359_vm0 = vcmask 1041408   ;;  %vm262_vm1 = vcmask 293888   ;;  %vm652_vm2 = vcmask 64512   ;;  %s2950_s1 = inlined_call_operand.vmem [shape: bf16[36,8], index: 1, kind: input, shape index: {}]   ;;  %s2951_s0 = inlined_call_operand.vmem [shape: bf16[512,36], index: 0, kind: input, shape index: {}]   ;;  %s2952_s2 = inlined_call_operand.vmem [shape: f32[1,8], index: 2, kind: input, shape index: {}]   ;;  %s2953_s3 = inlined_call_operand.vmem [shape: f32[1,8], index: 3, kind: input, shape index: {}]   ;;  %s2954_s4 = inlined_call_operand.vmem [shape: f32[512,8], index: 4, kind: output, shape index: {}]  }
   0x1   :  { %v1448_v0 = vld [vmem:[%s2950_s1 + $0x10] ss:$0 sps:$4 sm:$0x33]   ;;  %v1449_v1 = vld [vmem:[%s2950_s1 + $0x8] sm:$0xff]   ;;  %v1451_v3 = vld [vmem:[%s2951_s0] sm:$0xff]  }
   0x2   :  { %1446 = vmatprep.subr.msk.bf16.mxu0 %vm359_vm0, %v1448_v0  ;;  %v361_v2 = vsel %vm359_vm0, %v1448_v0, 0  ;;  %1447 = vmatprep.subr.msk.bf16.mxu1 %vm359_vm0, %v1448_v0  ;;  %v1450_v4 = vld [vmem:[%s2950_s1] sm:$0xff]   ;;  %v1452_v5 = vld [vmem:[%s2951_s0 + $0x8] sm:$0xff]   ;;  %v1453_v6 = vld [vmem:[%s2951_s0 + $0x10] sm:$0xff]  }
   0x3   :  { %1371 = vmatpush3.bf16.msra.mxu0 %v361_v2  ;;  %1443 = vmatpush3.bf16.msra.mxu1 %v361_v2  ;;  %v1454_v7 = vld [vmem:[%s2951_s0 + $0x18] sm:$0xff]   ;;  %v1455_v8 = vld [vmem:[%s2951_s0 + $0x20] sm:$0xff]   ;;  %v1468_v10 = vld [vmem:[%s2951_s0 + $0x88] sm:$0xff]  }
   0x4   :  { %1372 = vmatprep.subr.bf16.mxu0 %v1449_v1  ;;  %1441 = vmatprep.subr.bf16.mxu1 %v1449_v1  ;;  %v1467_v9 = vld [vmem:[%s2951_s0 + $0x80] sm:$0xff]   ;;  %v1469_v11 = vld [vmem:[%s2951_s0 + $0x90] sm:$0xff]   ;;  %v1456_v12 = vld [vmem:[%s2951_s0 + $0x28] sm:$0xff]  }
   0x5   :  { %1376 = vmatprep.mubr.msk.bf16.mxu0 %vm262_vm1, %v1451_v3  ;;  %1408 = vmatprep.mubr.msk.bf16.mxu1 %vm262_vm1, %v1467_v9  ;;  %v1457_v13 = vld [vmem:[%s2951_s0 + $0x30] sm:$0xff]   ;;  %v1470_v14 = vld [vmem:[%s2951_s0 + $0x98] sm:$0xff]   ;;  %v1471_v15 = vld [vmem:[%s2951_s0 + $0xa0] sm:$0xff]  }
   0x6   :  { %v1458_v16 = vld [vmem:[%s2951_s0 + $0x38] sm:$0xff]   ;;  %v1472_v17 = vld [vmem:[%s2951_s0 + $0xa8] sm:$0xff]   ;;  %v1459_v18 = vld [vmem:[%s2951_s0 + $0x40] sm:$0xff]  }
   0x7   :  { %1373 = vmatpush3.bf16.msra.mxu0 %v1449_v1  ;;  %1444 = vmatpush3.bf16.msra.mxu1 %v1449_v1  ;;  %v1473_v19 = vld [vmem:[%s2951_s0 + $0xb0] sm:$0xff]   ;;  %v1460_v20 = vld [vmem:[%s2951_s0 + $0x48] sm:$0xff]   ;;  %v1474_v21 = vld [vmem:[%s2951_s0 + $0xb8] sm:$0xff]  }
   0x8   :  { %1374 = vmatprep.subr.bf16.mxu0 %v1450_v4  ;;  %1442 = vmatprep.subr.bf16.mxu1 %v1450_v4  ;;  %v1461_v22 = vld [vmem:[%s2951_s0 + $0x50] sm:$0xff]   ;;  %v1475_v23 = vld [vmem:[%s2951_s0 + $0xc0] sm:$0xff]   ;;  %v1462_v24 = vld [vmem:[%s2951_s0 + $0x58] sm:$0xff]  }
   0x9   :  { %v1476_v25 = vld [vmem:[%s2951_s0 + $0xc8] sm:$0xff]   ;;  %v1463_v26 = vld [vmem:[%s2951_s0 + $0x60] sm:$0xff]   ;;  %v1477_v27 = vld [vmem:[%s2951_s0 + $0xd0] sm:$0xff]  }
   0xa   :  { %v1464_v28 = vld [vmem:[%s2951_s0 + $0x68] sm:$0xff]   ;;  %v1478_v29 = vld [vmem:[%s2951_s0 + $0xd8] sm:$0xff]   ;;  %v1465_v30 = vld [vmem:[%s2951_s0 + $0x70] sm:$0xff]  }
   0xb   :  { %1375 = vmatpush3.bf16.msra.mxu0 %v1450_v4  ;;  %1445 = vmatpush3.bf16.msra.mxu1 %v1450_v4  ;;  %v1479_v31 = vld [vmem:[%s2951_s0 + $0xe0] sm:$0xff]   ;;  %v1466_v32 = vld [vmem:[%s2951_s0 + $0x78] sm:$0xff]   ;;  %v1480_v33 = vld [vmem:[%s2951_s0 + $0xe8] sm:$0xff]  }
   0xc   :  { %v1481_v34 = vld [vmem:[%s2951_s0 + $0xf0] sm:$0xff]   ;;  %v1482_v35 = vld [vmem:[%s2951_s0 + $0xf8] sm:$0xff]  }
   0xe   :  { %1377 = vmatmul.mubr.msk.bf16.vlgmr.msra.gmra.mxu0 %vm262_vm1, %v1452_v5  ;;  %1409 = vmatmul.mubr.msk.bf16.vlgmr.msra.gmra.mxu1 %vm262_vm1, %v1468_v10 }
   0xf   :  { %1380 = vmatprep.mubr.msk.bf16.mxu0 %vm262_vm1, %v1453_v6  ;;  %1412 = vmatprep.mubr.msk.bf16.mxu1 %vm262_vm1, %v1469_v11 }
  0x16   :  { %1381 = vmatmul.mubr.msk.bf16.gmra.mxu0 %vm262_vm1, %v1454_v7  ;;  %1413 = vmatmul.mubr.msk.bf16.gmra.mxu1 %vm262_vm1, %v1470_v14 }
  0x17   :  { %1384 = vmatprep.mubr.msk.bf16.mxu0 %vm262_vm1, %v1455_v8  ;;  %1416 = vmatprep.mubr.msk.bf16.mxu1 %vm262_vm1, %v1471_v15 }
  0x1e   :  { %1385 = vmatmul.mubr.msk.bf16.gmra.mxu0 %vm262_vm1, %v1456_v12  ;;  %1417 = vmatmul.mubr.msk.bf16.gmra.mxu1 %vm262_vm1, %v1472_v17 }
  0x1f   :  { %1388 = vmatprep.mubr.msk.bf16.mxu0 %vm262_vm1, %v1457_v13  ;;  %1420 = vmatprep.mubr.msk.bf16.mxu1 %vm262_vm1, %v1473_v19 }
  0x26   :  { %1389 = vmatmul.mubr.msk.bf16.gmra.mxu0 %vm262_vm1, %v1458_v16  ;;  %1421 = vmatmul.mubr.msk.bf16.gmra.mxu1 %vm262_vm1, %v1474_v21 }
  0x27   :  { %1392 = vmatprep.mubr.msk.bf16.mxu0 %vm262_vm1, %v1459_v18  ;;  %1424 = vmatprep.mubr.msk.bf16.mxu1 %vm262_vm1, %v1475_v23 }
  0x2e   :  { %1393 = vmatmul.mubr.msk.bf16.gmra.mxu0 %vm262_vm1, %v1460_v20  ;;  %1425 = vmatmul.mubr.msk.bf16.gmra.mxu1 %vm262_vm1, %v1476_v25 }
  0x2f   :  { %1396 = vmatprep.mubr.msk.bf16.mxu0 %vm262_vm1, %v1461_v22  ;;  %1428 = vmatprep.mubr.msk.bf16.mxu1 %vm262_vm1, %v1477_v27 }
  0x36   :  { %1397 = vmatmul.mubr.msk.bf16.gmra.mxu0 %vm262_vm1, %v1462_v24  ;;  %1429 = vmatmul.mubr.msk.bf16.gmra.mxu1 %vm262_vm1, %v1478_v29 }
  0x37   :  { %1400 = vmatprep.mubr.msk.bf16.mxu0 %vm262_vm1, %v1463_v26  ;;  %1432 = vmatprep.mubr.msk.bf16.mxu1 %vm262_vm1, %v1479_v31 }
  0x3e   :  { %1401 = vmatmul.mubr.msk.bf16.gmra.mxu0 %vm262_vm1, %v1464_v28  ;;  %1433 = vmatmul.mubr.msk.bf16.gmra.mxu1 %vm262_vm1, %v1480_v33 }
  0x3f   :  { %1404 = vmatprep.mubr.msk.bf16.mxu0 %vm262_vm1, %v1465_v30  ;;  %1436 = vmatprep.mubr.msk.bf16.mxu1 %vm262_vm1, %v1481_v34 }
  0x46   :  { %1405 = vmatmul.mubr.msk.bf16.gmra.mxu0 %vm262_vm1, %v1466_v32  ;;  %1437 = vmatmul.mubr.msk.bf16.gmra.mxu1 %vm262_vm1, %v1482_v35 }
  0xce   :  { %v1647_v36 = vpop.f32.mrf.mxu0  ;;  %v1667_v47 = vpop.f32.mrf.mxu1 }
  0xcf   :  { %v790_v41 = vmul.f32 %v1647_v36, %v1647_v36  ;;  %2980 = vst [vmem:[#allocation2_spill] sm:$0xff] %v1667_v47  ;;  %v656_v48 = vsel %vm652_vm2, %v1647_v36, 0.0 }
  0xd0   :  { %v1649_v37 = vpop.f32.mrf.mxu0  ;;  %v1677_v55 = vpop.f32.mrf.mxu1 }
  0xd1   :  { %v788_v39 = vmul.f32 %v1649_v37, %v1649_v37  ;;  %v653_v42 = vsel %vm652_vm2, %v1649_v37, 0.0  ;;  %2981 = vst [vmem:[#allocation3_spill] sm:$0xff] %v1677_v55  ;;  %v855_v56 = vsel %vm652_vm2, %v790_v41, 0.0 }
  0xd2   :  { %v1651_v38 = vpop.f32.mrf.mxu0  ;;  %v1686_v62 = vpop.f32.mrf.mxu1 }
  0xd3   :  { %v852_v49 = vsel %vm652_vm2, %v788_v39, 0.0  ;;  %v791_v50 = vmul.f32 %v1651_v38, %v1651_v38  ;;  %v658_v57 = vsel %vm652_vm2, %v1651_v38, 0.0 }
  0xd4   :  { %v1655_v40 = vpop.f32.mrf.mxu0  ;;  %v1693_v4 = vpop.f32.mrf.mxu1 }
  0xd5   :  { %v654_v43 = vsel %vm652_vm2, %v1655_v40, 0.0  ;;  %v789_v44 = vmul.f32 %v1655_v40, %v1655_v40  ;;  %v857_v63 = vsel %vm652_vm2, %v791_v50, 0.0 }
  0xd6   :  { %v655_v45 = vadd.f32 %v654_v43, %v653_v42  ;;  %v1665_v46 = vpop.f32.mrf.mxu0  ;;  %v1704_v12 = vpop.f32.mrf.mxu1 }
  0xd7   :  { %v853_v51 = vsel %vm652_vm2, %v789_v44, 0.0  ;;  %v794_v5 = vmul.f32 %v1665_v46, %v1665_v46  ;;  %2982 = vst [vmem:[#allocation4_spill] sm:$0xff] %v1704_v12  ;;  %v664_v13 = vsel %vm652_vm2, %v1665_v46, 0.0 }
  0xd8   :  { %v657_v52 = vadd.f32 %v656_v48, %v655_v45  ;;  %v854_v53 = vadd.f32 %v853_v51, %v852_v49  ;;  %v1675_v54 = vpop.f32.mrf.mxu0  ;;  %v1713_v19 = vpop.f32.mrf.mxu1 }
  0xd9   :  { %v792_v58 = vmul.f32 %v1675_v54, %v1675_v54  ;;  %v660_v0 = vsel %vm652_vm2, %v1675_v54, 0.0  ;;  %2983 = vst [vmem:[#allocation5_spill] sm:$0xff] %v1713_v19  ;;  %v863_v20 = vsel %vm652_vm2, %v794_v5, 0.0 }
  0xda   :  { %v856_v59 = vadd.f32 %v855_v56, %v854_v53  ;;  %v659_v60 = vadd.f32 %v658_v57, %v657_v52  ;;  %v1684_v61 = vpop.f32.mrf.mxu0  ;;  %v1727_v31 = vpop.f32.mrf.mxu1 }
  0xdb   :  { %v859_v6 = vsel %vm652_vm2, %v792_v58, 0.0  ;;  %v795_v14 = vmul.f32 %v1684_v61, %v1684_v61  ;;  %v666_v21 = vsel %vm652_vm2, %v1684_v61, 0.0 }
  0xdc   :  { %v661_v1 = vadd.f32 %v660_v0, %v659_v60  ;;  %v858_v2 = vadd.f32 %v857_v63, %v856_v59  ;;  %v1691_v3 = vpop.f32.mrf.mxu0  ;;  %v1745_v51 = vpop.f32.mrf.mxu1 }
  0xdd   :  { %v662_v7 = vsel %vm652_vm2, %v1691_v3, 0.0  ;;  %v793_v8 = vmul.f32 %v1691_v3, %v1691_v3  ;;  %v865_v26 = vsel %vm652_vm2, %v795_v14, 0.0 }
  0xde   :  { %v860_v9 = vadd.f32 %v859_v6, %v858_v2  ;;  %v663_v10 = vadd.f32 %v662_v7, %v661_v1  ;;  %v1702_v11 = vpop.f32.mrf.mxu0  ;;  %v1759_v5 = vpop.f32.mrf.mxu1 }
  0xdf   :  { %v861_v15 = vsel %vm652_vm2, %v793_v8, 0.0  ;;  %v798_v32 = vmul.f32 %v1702_v11, %v1702_v11  ;;  %v672_v43 = vsel %vm652_vm2, %v1702_v11, 0.0  ;;  %2984 = vst [vmem:[#allocation6_spill] sm:$0xff] %v1759_v5 }
  0xe0   :  { %v665_v16 = vadd.f32 %v664_v13, %v663_v10  ;;  %v862_v17 = vadd.f32 %v861_v15, %v860_v9  ;;  %v1711_v18 = vpop.f32.mrf.mxu0 }
  0xe1   :  { %v796_v22 = vmul.f32 %v1711_v18, %v1711_v18  ;;  %v668_v27 = vsel %vm652_vm2, %v1711_v18, 0.0  ;;  %v871_v52 = vsel %vm652_vm2, %v798_v32, 0.0 }
  0xe2   :  { %v864_v23 = vadd.f32 %v863_v20, %v862_v17  ;;  %v667_v24 = vadd.f32 %v666_v21, %v665_v16  ;;  %v1720_v25 = vpop.f32.mrf.mxu0 }
  0xe3   :  { %v867_v33 = vsel %vm652_vm2, %v796_v22, 0.0  ;;  %v799_v44 = vmul.f32 %v1720_v25, %v1720_v25  ;;  %v674_v53 = vsel %vm652_vm2, %v1720_v25, 0.0 }
  0xe4   :  { %v669_v28 = vadd.f32 %v668_v27, %v667_v24  ;;  %v866_v29 = vadd.f32 %v865_v26, %v864_v23  ;;  %v1725_v30 = vpop.f32.mrf.mxu0  ;;  %v1777_v23 = vpop.f32.mrf.mxu1 }
  0xe5   :  { %v670_v34 = vsel %vm652_vm2, %v1725_v30, 0.0  ;;  %v797_v35 = vmul.f32 %v1725_v30, %v1725_v30  ;;  %v873_v60 = vsel %vm652_vm2, %v799_v44, 0.0  ;;  %2985 = vst [vmem:[#allocation7_spill] sm:$0xff] %v1777_v23 }
  0xe6   :  { %v868_v39 = vadd.f32 %v867_v33, %v866_v29  ;;  %v671_v41 = vadd.f32 %v670_v34, %v669_v28  ;;  %v1736_v42 = vpop.f32.mrf.mxu0 }
  0xe7   :  { %v869_v45 = vsel %vm652_vm2, %v797_v35, 0.0  ;;  %v802_v6 = vmul.f32 %v1736_v42, %v1736_v42  ;;  %v680_v15 = vsel %vm652_vm2, %v1736_v42, 0.0 }
  0xe8   :  { %v673_v48 = vadd.f32 %v672_v43, %v671_v41  ;;  %v870_v49 = vadd.f32 %v869_v45, %v868_v39  ;;  %v1743_v50 = vpop.f32.mrf.mxu0  ;;  %v1791_v43 = vpop.f32.mrf.mxu1 }
  0xe9   :  { %v800_v56 = vmul.f32 %v1743_v50, %v1743_v50  ;;  %v676_v63 = vsel %vm652_vm2, %v1743_v50, 0.0  ;;  %v879_v24 = vsel %vm652_vm2, %v802_v6, 0.0 }
  0xea   :  { %v872_v57 = vadd.f32 %v871_v52, %v870_v49  ;;  %v675_v58 = vadd.f32 %v674_v53, %v673_v48  ;;  %v1752_v59 = vpop.f32.mrf.mxu0  ;;  %v1809_v6 = vpop.f32.mrf.mxu1 }
  0xeb   :  { %v875_v7 = vsel %vm652_vm2, %v800_v56, 0.0  ;;  %v803_v16 = vmul.f32 %v1752_v59, %v1752_v59  ;;  %v682_v26 = vsel %vm652_vm2, %v1752_v59, 0.0 }
  0xec   :  { %v677_v0 = vadd.f32 %v676_v63, %v675_v58  ;;  %v874_v1 = vadd.f32 %v873_v60, %v872_v57  ;;  %v1757_v2 = vpop.f32.mrf.mxu0 }
  0xed   :  { %v678_v8 = vsel %vm652_vm2, %v1757_v2, 0.0  ;;  %v801_v9 = vmul.f32 %v1757_v2, %v1757_v2  ;;  %v881_v33 = vsel %vm652_vm2, %v803_v16, 0.0 }
  0xee   :  { %v876_v10 = vadd.f32 %v875_v7, %v874_v1  ;;  %v679_v13 = vadd.f32 %v678_v8, %v677_v0  ;;  %v1768_v14 = vpop.f32.mrf.mxu0 }
  0xef   :  { %v877_v17 = vsel %vm652_vm2, %v801_v9, 0.0  ;;  %v806_v44 = vmul.f32 %v1768_v14, %v1768_v14  ;;  %v688_v57 = vsel %vm652_vm2, %v1768_v14, 0.0 }
  0xf0   :  { %v681_v20 = vadd.f32 %v680_v15, %v679_v13  ;;  %v878_v21 = vadd.f32 %v877_v17, %v876_v10  ;;  %v1775_v22 = vpop.f32.mrf.mxu0 }
  0xf1   :  { %v804_v27 = vmul.f32 %v1775_v22, %v1775_v22  ;;  %v684_v34 = vsel %vm652_vm2, %v1775_v22, 0.0  ;;  %v887_v7 = vsel %vm652_vm2, %v806_v44, 0.0 }
  0xf2   :  { %v880_v28 = vadd.f32 %v879_v24, %v878_v21  ;;  %v683_v29 = vadd.f32 %v682_v26, %v681_v20  ;;  %v1784_v32 = vpop.f32.mrf.mxu0  ;;  %v1823_v26 = vpop.f32.mrf.mxu1 }
  0xf3   :  { %v883_v45 = vsel %vm652_vm2, %v804_v27, 0.0  ;;  %v807_v58 = vmul.f32 %v1784_v32, %v1784_v32  ;;  %v690_v8 = vsel %vm652_vm2, %v1784_v32, 0.0  ;;  %2986 = vst [vmem:[#allocation8_spill] sm:$0xff] %v1823_v26 }
  0xf4   :  { %v685_v35 = vadd.f32 %v684_v34, %v683_v29  ;;  %v882_v39 = vadd.f32 %v881_v33, %v880_v28  ;;  %v1789_v41 = vpop.f32.mrf.mxu0 }
  0xf5   :  { %v686_v48 = vsel %vm652_vm2, %v1789_v41, 0.0  ;;  %v805_v49 = vmul.f32 %v1789_v41, %v1789_v41  ;;  %v889_v16 = vsel %vm652_vm2, %v807_v58, 0.0 }
  0xf6   :  { %v884_v52 = vadd.f32 %v883_v45, %v882_v39  ;;  %v687_v53 = vadd.f32 %v686_v48, %v685_v35  ;;  %v1800_v56 = vpop.f32.mrf.mxu0 }
  0xf7   :  { %v885_v60 = vsel %vm652_vm2, %v805_v49, 0.0  ;;  %v810_v27 = vmul.f32 %v1800_v56, %v1800_v56  ;;  %v696_v44 = vsel %vm652_vm2, %v1800_v56, 0.0 }
  0xf8   :  { %v689_v63 = vadd.f32 %v688_v57, %v687_v53  ;;  %v886_v0 = vadd.f32 %v885_v60, %v884_v52  ;;  %v1807_v1 = vpop.f32.mrf.mxu0  ;;  %v1841_v57 = vpop.f32.mrf.mxu1 }
  0xf9   :  { %v808_v9 = vmul.f32 %v1807_v1, %v1807_v1  ;;  %v692_v17 = vsel %vm652_vm2, %v1807_v1, 0.0  ;;  %2987 = vst [vmem:[#allocation9_spill] sm:$0xff] %v1841_v57  ;;  %v895_v58 = vsel %vm652_vm2, %v810_v27, 0.0 }
  0xfa   :  { %v888_v10 = vadd.f32 %v887_v7, %v886_v0  ;;  %v691_v13 = vadd.f32 %v690_v8, %v689_v63  ;;  %v1816_v15 = vpop.f32.mrf.mxu0 }
  0xfb   :  { %v891_v28 = vsel %vm652_vm2, %v808_v9, 0.0  ;;  %v811_v45 = vmul.f32 %v1816_v15, %v1816_v15  ;;  %v698_v60 = vsel %vm652_vm2, %v1816_v15, 0.0 }
  0xfc   :  { %v693_v20 = vadd.f32 %v692_v17, %v691_v13  ;;  %v890_v21 = vadd.f32 %v889_v16, %v888_v10  ;;  %v1821_v24 = vpop.f32.mrf.mxu0 }
  0xfd   :  { %v694_v29 = vsel %vm652_vm2, %v1821_v24, 0.0  ;;  %v809_v33 = vmul.f32 %v1821_v24, %v1821_v24  ;;  %v897_v9 = vsel %vm652_vm2, %v811_v45, 0.0 }
  0xfe   :  { %v892_v34 = vadd.f32 %v891_v28, %v890_v21  ;;  %v695_v35 = vadd.f32 %v694_v29, %v693_v20  ;;  %v1832_v39 = vpop.f32.mrf.mxu0  ;;  %v1855_v20 = vpop.f32.mrf.mxu1 }
  0xff   :  { %v893_v48 = vsel %vm652_vm2, %v809_v33, 0.0  ;;  %v814_v21 = vmul.f32 %v1832_v39, %v1832_v39 }
 0x100   :  { %v697_v49 = vadd.f32 %v696_v44, %v695_v35  ;;  %v894_v52 = vadd.f32 %v893_v48, %v892_v34  ;;  %v1839_v53 = vpop.f32.mrf.mxu0  ;;  %v704_v44 = vsel %vm652_vm2, %v1832_v39, 0.0 }
 0x101   :  { %v812_v63 = vmul.f32 %v1839_v53, %v1839_v53  ;;  %v700_v10 = vsel %vm652_vm2, %v1839_v53, 0.0 }
 0x102   :  { %v896_v0 = vadd.f32 %v895_v58, %v894_v52  ;;  %v699_v7 = vadd.f32 %v698_v60, %v697_v49  ;;  %v1848_v8 = vpop.f32.mrf.mxu0  ;;  %v1873_v60 = vpop.f32.mrf.mxu1 }
 0x103   :  { %v899_v27 = vsel %vm652_vm2, %v812_v63, 0.0  ;;  %v815_v45 = vmul.f32 %v1848_v8, %v1848_v8  ;;  %v903_v63 = vsel %vm652_vm2, %v814_v21, 0.0 }
 0x104   :  { %v701_v13 = vadd.f32 %v700_v10, %v699_v7  ;;  %v898_v16 = vadd.f32 %v897_v9, %v896_v0  ;;  %v1853_v17 = vpop.f32.mrf.mxu0  ;;  %v706_v0 = vsel %vm652_vm2, %v1848_v8, 0.0  ;;  %v1887_v21 = vpop.f32.mrf.mxu1 }
 0x105   :  { %v702_v28 = vsel %vm652_vm2, %v1853_v17, 0.0  ;;  %v813_v29 = vmul.f32 %v1853_v17, %v1853_v17  ;;  %2990 = vst [vmem:[#allocation12_spill] sm:$0xff] %v1887_v21 }
 0x106   :  { %v900_v33 = vadd.f32 %v899_v27, %v898_v16  ;;  %v703_v34 = vadd.f32 %v702_v28, %v701_v13  ;;  %v1864_v35 = vpop.f32.mrf.mxu0  ;;  %v905_v16 = vsel %vm652_vm2, %v815_v45, 0.0 }
 0x107   :  { %2988 = vst [vmem:[#allocation10_spill] sm:$0xff] %v1864_v35  ;;  %v901_v48 = vsel %vm652_vm2, %v813_v29, 0.0 }
 0x108   :  { %v705_v49 = vadd.f32 %v704_v44, %v703_v34  ;;  %v902_v52 = vadd.f32 %v901_v48, %v900_v33  ;;  %v1871_v58 = vpop.f32.mrf.mxu0  ;;  %v818_v34 = vmul.f32 %v1864_v35, %v1864_v35 }
 0x109   :  { %2989 = vst [vmem:[#allocation11_spill] sm:$0xff] %v1871_v58  ;;  %v816_v7 = vmul.f32 %v1871_v58, %v1871_v58  ;;  %v708_v27 = vsel %vm652_vm2, %v1871_v58, 0.0 }
 0x10a   :  { %v904_v9 = vadd.f32 %v903_v63, %v902_v52  ;;  %v707_v10 = vadd.f32 %v706_v0, %v705_v49  ;;  %v1880_v13 = vpop.f32.mrf.mxu0  ;;  %v712_v63 = vsel %vm652_vm2, %v1864_v35, 0.0  ;;  %v716_v35 = vsel %vm652_vm2, %v1677_v55, 0.0 }
 0x10b   :  { %v907_v44 = vsel %vm652_vm2, %v816_v7, 0.0  ;;  %v819_v0 = vmul.f32 %v1880_v13, %v1880_v13  ;;  %v911_v7 = vsel %vm652_vm2, %v818_v34, 0.0  ;;  %v714_v58 = vsel %vm652_vm2, %v1880_v13, 0.0 }
 0x10c   :  { %v709_v28 = vadd.f32 %v708_v27, %v707_v10  ;;  %v906_v29 = vadd.f32 %v905_v16, %v904_v9  ;;  %v1885_v33 = vpop.f32.mrf.mxu0  ;;  %v1901_v27 = vpop.f32.mrf.mxu1  ;;  %v822_v34 = vmul.f32 %v1667_v47, %v1667_v47 }
 0x10d   :  { %v710_v48 = vsel %vm652_vm2, %v1885_v33, 0.0  ;;  %v817_v45 = vmul.f32 %v1885_v33, %v1885_v33  ;;  %2991 = vst [vmem:[#allocation13_spill] sm:$0xff] %v1901_v27 }
 0x10e   :  { %v908_v49 = vadd.f32 %v907_v44, %v906_v29  ;;  %v711_v52 = vadd.f32 %v710_v48, %v709_v28  ;;  %v820_v28 = vmul.f32 %v1677_v55, %v1677_v55  ;;  %v913_v48 = vsel %vm652_vm2, %v819_v0, 0.0 }
 0x10f   :  { %v909_v9 = vsel %vm652_vm2, %v817_v45, 0.0  ;;  %v821_v45 = vmul.f32 %v1693_v4, %v1693_v4  ;;  %v919_v55 = vsel %vm652_vm2, %v822_v34, 0.0  ;;  %v826_v34 = vmul.f32 %v1704_v12, %v1704_v12 }
 0x110   :  { %v713_v10 = vadd.f32 %v712_v63, %v711_v52  ;;  %v910_v16 = vadd.f32 %v909_v9, %v908_v49  ;;  %v1913_v63 = vpop.f32.mrf.mxu1  ;;  %v915_v9 = vsel %vm652_vm2, %v820_v28, 0.0  ;;  %v722_v28 = vsel %vm652_vm2, %v1686_v62, 0.0 }
 0x112   :  { %v715_v29 = vadd.f32 %v714_v58, %v713_v10  ;;  %v912_v44 = vadd.f32 %v911_v7, %v910_v16  ;;  %v718_v58 = vsel %vm652_vm2, %v1693_v4, 0.0  ;;  %v720_v16 = vsel %vm652_vm2, %v1667_v47, 0.0 }
 0x113   :  { %v823_v7 = vmul.f32 %v1686_v62, %v1686_v62  ;;  %v724_v47 = vsel %vm652_vm2, %v1713_v19, 0.0 }
 0x114   :  { %v914_v49 = vadd.f32 %v913_v48, %v912_v44  ;;  %v717_v52 = vadd.f32 %v716_v35, %v715_v29  ;;  %v917_v35 = vsel %vm652_vm2, %v821_v45, 0.0  ;;  %v1925_v48 = vpop.f32.mrf.mxu1  ;;  %v825_v45 = vmul.f32 %v1745_v51, %v1745_v51 }
 0x116   :  { %v719_v10 = vadd.f32 %v718_v58, %v717_v52  ;;  %v916_v0 = vadd.f32 %v915_v9, %v914_v49  ;;  %v824_v49 = vmul.f32 %v1713_v19, %v1713_v19  ;;  %v921_v58 = vsel %vm652_vm2, %v823_v7, 0.0 }
 0x117   :  { %v927_v19 = vsel %vm652_vm2, %v826_v34, 0.0  ;;  %v830_v34 = vmul.f32 %v1759_v5, %v1759_v5 }
 0x118   :  { %v721_v29 = vadd.f32 %v720_v16, %v719_v10  ;;  %v918_v44 = vadd.f32 %v917_v35, %v916_v0  ;;  %v1937_v16 = vpop.f32.mrf.mxu1  ;;  %v923_v35 = vsel %vm652_vm2, %v824_v49, 0.0  ;;  %v730_v49 = vsel %vm652_vm2, %v1727_v31, 0.0 }
 0x119   :  { %2992 = vst [vmem:[#allocation14_spill] sm:$0xff] %v1937_v16 }
 0x11a   :  { %v920_v52 = vadd.f32 %v919_v55, %v918_v44  ;;  %v723_v9 = vadd.f32 %v722_v28, %v721_v29  ;;  %v726_v55 = vsel %vm652_vm2, %v1745_v51, 0.0  ;;  %v728_v44 = vsel %vm652_vm2, %v1704_v12, 0.0 }
 0x11b   :  { %v827_v28 = vmul.f32 %v1727_v31, %v1727_v31  ;;  %v732_v12 = vsel %vm652_vm2, %v1777_v23, 0.0 }
 0x11c   :  { %v725_v10 = vadd.f32 %v724_v47, %v723_v9  ;;  %v922_v0 = vadd.f32 %v921_v58, %v920_v52  ;;  %v925_v47 = vsel %vm652_vm2, %v825_v45, 0.0  ;;  %v1949_v58 = vpop.f32.mrf.mxu1  ;;  %v829_v45 = vmul.f32 %v1809_v6, %v1809_v6 }
 0x11d   :  { %2993 = vst [vmem:[#allocation15_spill] sm:$0xff] %v1949_v58 }
 0x11e   :  { %v924_v29 = vadd.f32 %v923_v35, %v922_v0  ;;  %v727_v7 = vadd.f32 %v726_v55, %v725_v10  ;;  %v828_v10 = vmul.f32 %v1777_v23, %v1777_v23  ;;  %v929_v55 = vsel %vm652_vm2, %v827_v28, 0.0 }
 0x11f   :  { %v935_v23 = vsel %vm652_vm2, %v830_v34, 0.0  ;;  %v834_v34 = vmul.f32 %v1823_v26, %v1823_v26 }
 0x120   :  { %v729_v52 = vadd.f32 %v728_v44, %v727_v7  ;;  %v926_v9 = vadd.f32 %v925_v47, %v924_v29  ;;  %v1961_v44 = vpop.f32.mrf.mxu1  ;;  %v931_v47 = vsel %vm652_vm2, %v828_v10, 0.0  ;;  %v738_v10 = vsel %vm652_vm2, %v1791_v43, 0.0 }
 0x121   :  { %2994 = vst [vmem:[#allocation16_spill] sm:$0xff] %v1961_v44 }
 0x122   :  { %v928_v0 = vadd.f32 %v927_v19, %v926_v9  ;;  %v731_v35 = vadd.f32 %v730_v49, %v729_v52  ;;  %v734_v19 = vsel %vm652_vm2, %v1809_v6, 0.0  ;;  %v736_v9 = vsel %vm652_vm2, %v1759_v5, 0.0 }
 0x123   :  { %v831_v49 = vmul.f32 %v1791_v43, %v1791_v43  ;;  %v740_v5 = vsel %vm652_vm2, %v1841_v57, 0.0 }
 0x124   :  { %v733_v29 = vadd.f32 %v732_v12, %v731_v35  ;;  %v930_v7 = vadd.f32 %v929_v55, %v928_v0  ;;  %v933_v12 = vsel %vm652_vm2, %v829_v45, 0.0  ;;  %v1973_v55 = vpop.f32.mrf.mxu1  ;;  %v833_v45 = vmul.f32 %v1873_v60, %v1873_v60 }
 0x125   :  { %2995 = vst [vmem:[#allocation17_spill] sm:$0xff] %v1973_v55 }
 0x126   :  { %v932_v52 = vadd.f32 %v931_v47, %v930_v7  ;;  %v735_v28 = vadd.f32 %v734_v19, %v733_v29  ;;  %v832_v29 = vmul.f32 %v1841_v57, %v1841_v57  ;;  %v937_v19 = vsel %vm652_vm2, %v831_v49, 0.0 }
 0x127   :  { %v943_v57 = vsel %vm652_vm2, %v834_v34, 0.0  ;;  %v838_v34 = vmul.f32 %v1887_v21, %v1887_v21 }
 0x128   :  { %v737_v0 = vadd.f32 %v736_v9, %v735_v28  ;;  %v934_v35 = vadd.f32 %v933_v12, %v932_v52  ;;  %v1985_v9 = vpop.f32.mrf.mxu1  ;;  %v939_v12 = vsel %vm652_vm2, %v832_v29, 0.0  ;;  %v746_v29 = vsel %vm652_vm2, %v1855_v20, 0.0 }
 0x129   :  { %2996 = vst [vmem:[#allocation18_spill] sm:$0xff] %v1985_v9 }
 0x12a   :  { %v936_v7 = vadd.f32 %v935_v23, %v934_v35  ;;  %v739_v47 = vadd.f32 %v738_v10, %v737_v0  ;;  %v742_v23 = vsel %vm652_vm2, %v1873_v60, 0.0  ;;  %v744_v35 = vsel %vm652_vm2, %v1823_v26, 0.0 }
 0x12b   :  { %v835_v10 = vmul.f32 %v1855_v20, %v1855_v20  ;;  %v748_v26 = vsel %vm652_vm2, %v1901_v27, 0.0 }
 0x12c   :  { %v741_v52 = vadd.f32 %v740_v5, %v739_v47  ;;  %v938_v28 = vadd.f32 %v937_v19, %v936_v7  ;;  %v941_v5 = vsel %vm652_vm2, %v833_v45, 0.0  ;;  %v1997_v19 = vpop.f32.mrf.mxu1  ;;  %v837_v45 = vmul.f32 %v1925_v48, %v1925_v48 }
 0x12d   :  { %2997 = vst [vmem:[#allocation19_spill] sm:$0xff] %v1997_v19 }
 0x12e   :  { %v940_v0 = vadd.f32 %v939_v12, %v938_v28  ;;  %v743_v49 = vadd.f32 %v742_v23, %v741_v52  ;;  %v836_v52 = vmul.f32 %v1901_v27, %v1901_v27  ;;  %v945_v23 = vsel %vm652_vm2, %v835_v10, 0.0 }
 0x12f   :  { %v951_v27 = vsel %vm652_vm2, %v838_v34, 0.0  ;;  %v842_v34 = vmul.f32 %v1937_v16, %v1937_v16 }
 0x130   :  { %v745_v7 = vadd.f32 %v744_v35, %v743_v49  ;;  %v942_v47 = vadd.f32 %v941_v5, %v940_v0  ;;  %v2009_v35 = vpop.f32.mrf.mxu1  ;;  %v947_v5 = vsel %vm652_vm2, %v836_v52, 0.0  ;;  %v754_v52 = vsel %vm652_vm2, %v1913_v63, 0.0 }
 0x131   :  { %2998 = vst [vmem:[#allocation20_spill] sm:$0xff] %v2009_v35 }
 0x132   :  { %v944_v28 = vadd.f32 %v943_v57, %v942_v47  ;;  %v747_v12 = vadd.f32 %v746_v29, %v745_v7  ;;  %v750_v57 = vsel %vm652_vm2, %v1925_v48, 0.0  ;;  %v752_v47 = vsel %vm652_vm2, %v1887_v21, 0.0 }
 0x133   :  { %v839_v29 = vmul.f32 %v1913_v63, %v1913_v63  ;;  %v756_v21 = vsel %vm652_vm2, %v1949_v58, 0.0 }
 0x134   :  { %v749_v0 = vadd.f32 %v748_v26, %v747_v12  ;;  %v946_v49 = vadd.f32 %v945_v23, %v944_v28  ;;  %v949_v26 = vsel %vm652_vm2, %v837_v45, 0.0  ;;  %v2021_v23 = vpop.f32.mrf.mxu1  ;;  %v841_v45 = vmul.f32 %v1973_v55, %v1973_v55 }
 0x135   :  { %2999 = vst [vmem:[#allocation21_spill] sm:$0xff] %v2021_v23 }
 0x136   :  { %v948_v7 = vadd.f32 %v947_v5, %v946_v49  ;;  %v751_v10 = vadd.f32 %v750_v57, %v749_v0  ;;  %v840_v0 = vmul.f32 %v1949_v58, %v1949_v58  ;;  %v953_v57 = vsel %vm652_vm2, %v839_v29, 0.0 }
 0x137   :  { %v959_v58 = vsel %vm652_vm2, %v842_v34, 0.0  ;;  %v846_v34 = vmul.f32 %v1985_v9, %v1985_v9 }
 0x138   :  { %v753_v28 = vadd.f32 %v752_v47, %v751_v10  ;;  %v950_v12 = vadd.f32 %v949_v26, %v948_v7  ;;  %v2033_v47 = vpop.f32.mrf.mxu1  ;;  %v955_v26 = vsel %vm652_vm2, %v840_v0, 0.0  ;;  %v762_v0 = vsel %vm652_vm2, %v1961_v44, 0.0 }
 0x139   :  { %3000 = vst [vmem:[#allocation22_spill] sm:$0xff] %v2033_v47 }
 0x13a   :  { %v952_v49 = vadd.f32 %v951_v27, %v950_v12  ;;  %v755_v5 = vadd.f32 %v754_v52, %v753_v28  ;;  %v758_v27 = vsel %vm652_vm2, %v1973_v55, 0.0  ;;  %v760_v12 = vsel %vm652_vm2, %v1937_v16, 0.0 }
 0x13b   :  { %v843_v52 = vmul.f32 %v1961_v44, %v1961_v44  ;;  %v764_v16 = vsel %vm652_vm2, %v1997_v19, 0.0 }
 0x13c   :  { %v757_v7 = vadd.f32 %v756_v21, %v755_v5  ;;  %v954_v10 = vadd.f32 %v953_v57, %v952_v49  ;;  %v957_v21 = vsel %vm652_vm2, %v841_v45, 0.0  ;;  %v2045_v57 = vpop.f32.mrf.mxu1  ;;  %v845_v45 = vmul.f32 %v2021_v23, %v2021_v23 }
 0x13d   :  { %3001 = vst [vmem:[#allocation23_spill] sm:$0xff] %v2045_v57 }
 0x13e   :  { %v956_v28 = vadd.f32 %v955_v26, %v954_v10  ;;  %v759_v29 = vadd.f32 %v758_v27, %v757_v7  ;;  %v844_v7 = vmul.f32 %v1997_v19, %v1997_v19  ;;  %v961_v27 = vsel %vm652_vm2, %v843_v52, 0.0 }
 0x13f   :  { %v967_v19 = vsel %vm652_vm2, %v846_v34, 0.0  ;;  %v850_v34 = vmul.f32 %v2033_v47, %v2033_v47 }
 0x140   :  { %v761_v49 = vadd.f32 %v760_v12, %v759_v29  ;;  %v958_v5 = vadd.f32 %v957_v21, %v956_v28  ;;  %v2057_v12 = vpop.f32.mrf.mxu1  ;;  %v963_v21 = vsel %vm652_vm2, %v844_v7, 0.0  ;;  %v770_v7 = vsel %vm652_vm2, %v2009_v35, 0.0 }
 0x141   :  { %3002 = vst [vmem:[#allocation24_spill] sm:$0xff] %v2057_v12 }
 0x142   :  { %v960_v10 = vadd.f32 %v959_v58, %v958_v5  ;;  %v763_v26 = vadd.f32 %v762_v0, %v761_v49  ;;  %v766_v58 = vsel %vm652_vm2, %v2021_v23, 0.0  ;;  %v768_v5 = vsel %vm652_vm2, %v1985_v9, 0.0 }
 0x143   :  { %v847_v0 = vmul.f32 %v2009_v35, %v2009_v35  ;;  %v772_v9 = vsel %vm652_vm2, %v2045_v57, 0.0 }
 0x144   :  { %v765_v28 = vadd.f32 %v764_v16, %v763_v26  ;;  %v962_v29 = vadd.f32 %v961_v27, %v960_v10  ;;  %v965_v16 = vsel %vm652_vm2, %v845_v45, 0.0  ;;  %v2069_v27 = vpop.f32.mrf.mxu1 }
 0x145   :  { %3003 = vst [vmem:[#allocation25_spill] sm:$0xff] %v2069_v27  ;;  %v849_v45 = vmul.f32 %v2069_v27, %v2069_v27 }
 0x146   :  { %v964_v49 = vadd.f32 %v963_v21, %v962_v29  ;;  %v767_v52 = vadd.f32 %v766_v58, %v765_v28  ;;  %v848_v28 = vmul.f32 %v2045_v57, %v2045_v57  ;;  %v969_v58 = vsel %vm652_vm2, %v847_v0, 0.0 }
 0x147   :  { %v776_v0 = vsel %vm652_vm2, %v2033_v47, 0.0 }
 0x148   :  { %v769_v10 = vadd.f32 %v768_v5, %v767_v52  ;;  %v966_v26 = vadd.f32 %v965_v16, %v964_v49  ;;  %v971_v5 = vsel %vm652_vm2, %v848_v28, 0.0  ;;  %v774_v16 = vsel %vm652_vm2, %v2069_v27, 0.0 }
 0x149   :  { %v778_v28 = vsel %vm652_vm2, %v2057_v12, 0.0 }
 0x14a   :  { %v968_v29 = vadd.f32 %v967_v19, %v966_v26  ;;  %v771_v21 = vadd.f32 %v770_v7, %v769_v10  ;;  %v851_v26 = vmul.f32 %v2057_v12, %v2057_v12  ;;  %v973_v7 = vsel %vm652_vm2, %v849_v45, 0.0 }
 0x14c   :  { %v773_v49 = vadd.f32 %v772_v9, %v771_v21  ;;  %v970_v52 = vadd.f32 %v969_v58, %v968_v29  ;;  %v975_v21 = vsel %vm652_vm2, %v850_v34, 0.0 }
 0x14e   :  { %v972_v19 = vadd.f32 %v971_v5, %v970_v52  ;;  %v775_v10 = vadd.f32 %v774_v16, %v773_v49  ;;  %v977_v52 = vsel %vm652_vm2, %v851_v26, 0.0  ;;  %v997_v26 = vlaneseq }
 0x150   :  { %v777_v9 = vadd.f32 %v776_v0, %v775_v10  ;;  %v974_v29 = vadd.f32 %v973_v7, %v972_v19 }
 0x152   :  { %v779_v58 = vadd.f32 %v778_v28, %v777_v9  ;;  %v976_v57 = vadd.f32 %v975_v21, %v974_v29 }
 0x154   :  { %v780_v49 = vrot.slane %v779_v58, 4  ;;  %v978_v5 = vadd.f32 %v977_v52, %v976_v57  ;;  %v2095_v57 = vshrl.u32 %v997_v26, 7 }
 0x156   :  { %v781_v16 = vadd.f32 %v780_v49, %v779_v58  ;;  %v979_v47 = vrot.slane %v978_v5, 4 }
 0x158   :  { %v782_v27 = vrot.slane %v781_v16, 2  ;;  %v980_v35 = vadd.f32 %v979_v47, %v978_v5  ;;  %v989_v47 = vld [vmem:[%s2952_s2] sm:$0x1] }
 0x15a   :  { %v783_v23 = vadd.f32 %v782_v27, %v781_v16  ;;  %v981_v44 = vrot.slane %v980_v35, 2  ;;  %v2979_v27 = vsub.s32 0, %v2095_v57 }
 0x15c   :  { %v784_v45 = vrot.slane %v783_v23, 1  ;;  %v982_v10 = vadd.f32 %v981_v44, %v980_v35 }
 0x15e   :  { %v785_v19 = vadd.f32 %v784_v45, %v783_v23  ;;  %v983_v0 = vrot.slane %v982_v10, 1  ;;  %v2104_v23 = vld [vmem:[%s2953_s3] sm:$0x1]  ;;  %v3004_v45 = vld [vmem:[#allocation11_spill] sm:$0xff] }
 0x160   :  { %v787_v34 = vmul.f32 0.001953125, %v785_v19  ;;  %v984_v7 = vadd.f32 %v983_v0, %v982_v10  ;;  %v3005_v10 = vld [vmem:[#allocation10_spill] sm:$0xff]  ;;  %v3006_v19 = vld [vmem:[#allocation3_spill] sm:$0xff] }
 0x162   :  { %v985_v55 = vmul.f32 0.001953125, %v984_v7  ;;  %v986_v12 = vmul.f32 %v787_v34, %v787_v34 }
 0x164   :  { %v987_v9 = vsub.f32 %v985_v55, %v986_v12 }
 0x166   :  { %v988_v29 = vmax.f32 %v987_v9, 0.0  ;;  %v3008_v9 = vld [vmem:[#allocation5_spill] sm:$0xff] }
 0x168   :  { %v990_v21 = vadd.f32 0.001, %v988_v29 }
 0x16a   :  { %1483 = vrsqrt.f32 %v990_v21  ;;  %v3009_v21 = vld [vmem:[#allocation4_spill] sm:$0xff] }
 0x177   :  { %v1484_v44 = vpop.eup %1483 }
 0x178   :  { %v992_v35 = vmul.f32 %v1484_v44, %v989_v47  ;;  %v3010_v47 = vld [vmem:[#allocation7_spill] sm:$0xff] }
 0x17a   :  { %v2106_v55 = vmul.f32 %v992_v35, %v787_v34  ;;  %v2110_v12 = vrot.slane %v992_v35, %v2979_v27  ;;  %v3007_v34 = vld [vmem:[#allocation2_spill] sm:$0xff]  ;;  %v3024_v27 = vld [vmem:[#allocation16_spill] sm:$0xff] }
 0x17b   :  { %v3011_v35 = vld [vmem:[#allocation6_spill] sm:$0xff] }
 0x17c   :  { %v995_v28 = vsub.f32 %v2104_v23, %v2106_v55  ;;  %v2116_v58 = vmul.f32 %v2110_v12, %v1649_v37  ;;  %v2120_v52 = vmul.f32 %v2110_v12, %v1655_v40  ;;  %v2124_v49 = vmul.f32 %v1647_v36, %v2110_v12  ;;  %v3012_v55 = vld [vmem:[#allocation9_spill] sm:$0xff] }
 0x17d   :  { %v2128_v5 = vmul.f32 %v1651_v38, %v2110_v12  ;;  %v2132_v16 = vmul.f32 %v2110_v12, %v1675_v54  ;;  %v2136_v37 = vmul.f32 %v2110_v12, %v1691_v3  ;;  %v2140_v40 = vmul.f32 %v1665_v46, %v2110_v12 }
 0x17e   :  { %v2144_v36 = vmul.f32 %v1684_v61, %v2110_v12  ;;  %v2148_v38 = vmul.f32 %v2110_v12, %v1711_v18  ;;  %v2152_v54 = vmul.f32 %v2110_v12, %v1725_v30  ;;  %v2156_v3 = vmul.f32 %v1702_v11, %v2110_v12 }
 0x17f   :  { %v2160_v46 = vmul.f32 %v1720_v25, %v2110_v12  ;;  %v2164_v61 = vmul.f32 %v2110_v12, %v1743_v50  ;;  %v2168_v18 = vmul.f32 %v2110_v12, %v1757_v2  ;;  %v2172_v30 = vmul.f32 %v1736_v42, %v2110_v12 }
 0x180   :  { %v2176_v11 = vmul.f32 %v1752_v59, %v2110_v12  ;;  %v2180_v25 = vmul.f32 %v2110_v12, %v1775_v22  ;;  %v2184_v50 = vmul.f32 %v2110_v12, %v1789_v41  ;;  %v2188_v2 = vmul.f32 %v1768_v14, %v2110_v12 }
 0x181   :  { %v2192_v42 = vmul.f32 %v1784_v32, %v2110_v12  ;;  %v2196_v59 = vmul.f32 %v2110_v12, %v1807_v1  ;;  %v2200_v22 = vmul.f32 %v2110_v12, %v1821_v24  ;;  %v2204_v41 = vmul.f32 %v1800_v56, %v2110_v12 }
 0x182   :  { %v2208_v14 = vmul.f32 %v1816_v15, %v2110_v12  ;;  %v2212_v32 = vmul.f32 %v2110_v12, %v1839_v53  ;;  %v2216_v1 = vmul.f32 %v2110_v12, %v1853_v17  ;;  %v2220_v24 = vmul.f32 %v1832_v39, %v2110_v12 }
 0x183   :  { %v2224_v56 = vmul.f32 %v1848_v8, %v2110_v12  ;;  %v2228_v15 = vmul.f32 %v2110_v12, %v3004_v45  ;;  %v2232_v53 = vmul.f32 %v2110_v12, %v1885_v33  ;;  %v2236_v17 = vmul.f32 %v3005_v10, %v2110_v12  ;;  %v3013_v10 = vld [vmem:[#allocation8_spill] sm:$0xff] }
 0x184   :  { %v2240_v39 = vmul.f32 %v1880_v13, %v2110_v12  ;;  %v2244_v8 = vmul.f32 %v2110_v12, %v3006_v19  ;;  %v2248_v0 = vmul.f32 %v2110_v12, %v1693_v4  ;;  %v2252_v33 = vmul.f32 %v3007_v34, %v2110_v12  ;;  %v3014_v34 = vld [vmem:[#allocation13_spill] sm:$0xff] }
 0x185   :  { %v2256_v7 = vmul.f32 %v1686_v62, %v2110_v12  ;;  %v2260_v13 = vmul.f32 %v2110_v12, %v3008_v9  ;;  %v2264_v29 = vmul.f32 %v2110_v12, %v1745_v51  ;;  %v2268_v4 = vmul.f32 %v3009_v21, %v2110_v12  ;;  %v3015_v21 = vld [vmem:[#allocation12_spill] sm:$0xff] }
 0x186   :  { %v2272_v26 = vmul.f32 %v1727_v31, %v2110_v12  ;;  %v2276_v62 = vmul.f32 %v2110_v12, %v3010_v47  ;;  %v2280_v44 = vmul.f32 %v2110_v12, %v1809_v6  ;;  %v2284_v51 = vmul.f32 %v3011_v35, %v2110_v12  ;;  %v3018_v35 = vld [vmem:[#allocation15_spill] sm:$0xff] }
 0x187   :  { %v2288_v23 = vmul.f32 %v1791_v43, %v2110_v12  ;;  %v2292_v31 = vmul.f32 %v2110_v12, %v3012_v55  ;;  %v2296_v45 = vmul.f32 %v2110_v12, %v1873_v60  ;;  %v2300_v6 = vmul.f32 %v3013_v10, %v2110_v12  ;;  %v3020_v55 = vld [vmem:[#allocation17_spill] sm:$0xff] }
 0x188   :  { %v2304_v19 = vmul.f32 %v1855_v20, %v2110_v12  ;;  %v2308_v43 = vmul.f32 %v2110_v12, %v3014_v34  ;;  %v2312_v9 = vmul.f32 %v2110_v12, %v1925_v48  ;;  %v2316_v60 = vmul.f32 %v3015_v21, %v2110_v12  ;;  %v3022_v34 = vld [vmem:[#allocation14_spill] sm:$0xff] }
 0x189   :  { %v2320_v47 = vmul.f32 %v1913_v63, %v2110_v12  ;;  %v2324_v20 = vmul.f32 %v2110_v12, %v3018_v35  ;;  %v2328_v10 = vmul.f32 %v2110_v12, %v3020_v55  ;;  %v2332_v48 = vmul.f32 %v3022_v34, %v2110_v12 }
 0x18a   :  { %3016 = vst [vmem:[#allocation11_spill] sm:$0xff] %v2316_v60  ;;  %v2336_v21 = vmul.f32 %v3024_v27, %v2110_v12  ;;  %v3026_v60 = vld [vmem:[#allocation19_spill] sm:$0xff] }
 0x18b   :  { %3017 = vst [vmem:[#allocation10_spill] sm:$0xff] %v2320_v47  ;;  %3019 = vst [vmem:[#allocation3_spill] sm:$0xff] %v2324_v20  ;;  %v2340_v63 = vmul.f32 %v2110_v12, %v3026_v60  ;;  %v3028_v47 = vld [vmem:[#allocation21_spill] sm:$0xff]  ;;  %v3030_v20 = vld [vmem:[#allocation18_spill] sm:$0xff] }
 0x18c   :  { %3021 = vst [vmem:[#allocation2_spill] sm:$0xff] %v2328_v10  ;;  %3023 = vst [vmem:[#allocation5_spill] sm:$0xff] %v2332_v48  ;;  %v2344_v35 = vmul.f32 %v2110_v12, %v3028_v47  ;;  %v2348_v55 = vmul.f32 %v3030_v20, %v2110_v12  ;;  %v3032_v10 = vld [vmem:[#allocation20_spill] sm:$0xff]  ;;  %v3033_v48 = vsub.s32 0, %v2095_v57 }
 0x18d   :  { %3025 = vst [vmem:[#allocation4_spill] sm:$0xff] %v2336_v21  ;;  %3027 = vst [vmem:[#allocation7_spill] sm:$0xff] %v2340_v63  ;;  %v2352_v34 = vmul.f32 %v3032_v10, %v2110_v12  ;;  %v3034_v21 = vld [vmem:[#allocation23_spill] sm:$0xff]  ;;  %v3035_v63 = vld [vmem:[#allocation25_spill] sm:$0xff] }
 0x18e   :  { %3029 = vst [vmem:[#allocation6_spill] sm:$0xff] %v2344_v35  ;;  %3031 = vst [vmem:[#allocation9_spill] sm:$0xff] %v2348_v55  ;;  %v2356_v27 = vrot.slane %v995_v28, %v3033_v48  ;;  %v2360_v60 = vmul.f32 %v2110_v12, %v3034_v21  ;;  %v2364_v47 = vmul.f32 %v2110_v12, %v3035_v63  ;;  %v3036_v35 = vld [vmem:[#allocation22_spill] sm:$0xff]  ;;  %v3037_v55 = vld [vmem:[#allocation24_spill] sm:$0xff] }
 0x18f   :  { %v2368_v20 = vmul.f32 %v3036_v35, %v2110_v12  ;;  %v2372_v10 = vmul.f32 %v3037_v55, %v2110_v12 }
 0x190   :  { %v2376_v57 = vadd.f32 %v2356_v27, %v2116_v58  ;;  %v2380_v28 = vadd.f32 %v2356_v27, %v2120_v52  ;;  %v2384_v48 = vadd.f32 %v2356_v27, %v2124_v49  ;;  %v2388_v21 = vadd.f32 %v2356_v27, %v2128_v5 }
 0x191   :  { %v2392_v12 = vadd.f32 %v2356_v27, %v2132_v16  ;;  %v2396_v58 = vadd.f32 %v2356_v27, %v2136_v37  ;;  %v2400_v52 = vadd.f32 %v2356_v27, %v2140_v40  ;;  %v2404_v49 = vadd.f32 %v2356_v27, %v2144_v36  ;;  %v3041_v63 = vld [vmem:[#allocation11_spill] sm:$0xff] }
 0x192   :  { %v2408_v5 = vadd.f32 %v2356_v27, %v2148_v38  ;;  %v2412_v16 = vadd.f32 %v2356_v27, %v2152_v54  ;;  %v2416_v37 = vadd.f32 %v2356_v27, %v2156_v3  ;;  %v2420_v40 = vadd.f32 %v2356_v27, %v2160_v46  ;;  %v3043_v35 = vld [vmem:[#allocation10_spill] sm:$0xff]  ;;  %v3045_v55 = vld [vmem:[#allocation3_spill] sm:$0xff] }
 0x193   :  { %v2424_v36 = vadd.f32 %v2356_v27, %v2164_v61  ;;  %v2428_v38 = vadd.f32 %v2356_v27, %v2168_v18  ;;  %v2432_v54 = vadd.f32 %v2356_v27, %v2172_v30  ;;  %v2436_v3 = vadd.f32 %v2356_v27, %v2176_v11 }
 0x194   :  { %v2440_v46 = vadd.f32 %v2356_v27, %v2180_v25  ;;  %v2444_v61 = vadd.f32 %v2356_v27, %v2184_v50  ;;  %v2448_v18 = vadd.f32 %v2356_v27, %v2188_v2  ;;  %v2452_v30 = vadd.f32 %v2356_v27, %v2192_v42 }
 0x195   :  { %v2456_v11 = vadd.f32 %v2356_v27, %v2196_v59  ;;  %v2460_v25 = vadd.f32 %v2356_v27, %v2200_v22  ;;  %v2464_v50 = vadd.f32 %v2356_v27, %v2204_v41  ;;  %v2468_v2 = vadd.f32 %v2356_v27, %v2208_v14 }
 0x196   :  { %v2472_v42 = vadd.f32 %v2356_v27, %v2212_v32  ;;  %v2476_v59 = vadd.f32 %v2356_v27, %v2216_v1  ;;  %v2480_v22 = vadd.f32 %v2356_v27, %v2220_v24  ;;  %v2484_v41 = vadd.f32 %v2356_v27, %v2224_v56 }
 0x197   :  { %v2488_v14 = vadd.f32 %v2356_v27, %v2228_v15  ;;  %v2492_v32 = vadd.f32 %v2356_v27, %v2232_v53  ;;  %v2496_v1 = vadd.f32 %v2356_v27, %v2236_v17  ;;  %v2500_v24 = vadd.f32 %v2356_v27, %v2240_v39 }
 0x198   :  { %v2504_v56 = vadd.f32 %v2356_v27, %v2244_v8  ;;  %v2508_v15 = vadd.f32 %v2356_v27, %v2248_v0  ;;  %v2512_v53 = vadd.f32 %v2356_v27, %v2252_v33  ;;  %v2516_v17 = vadd.f32 %v2356_v27, %v2256_v7 }
 0x199   :  { %v2520_v39 = vadd.f32 %v2356_v27, %v2260_v13  ;;  %v2524_v8 = vadd.f32 %v2356_v27, %v2264_v29  ;;  %v2528_v0 = vadd.f32 %v2356_v27, %v2268_v4  ;;  %v2532_v33 = vadd.f32 %v2356_v27, %v2272_v26 }
 0x19a   :  { %v2536_v7 = vadd.f32 %v2356_v27, %v2276_v62  ;;  %v2540_v13 = vadd.f32 %v2356_v27, %v2280_v44  ;;  %v2544_v29 = vadd.f32 %v2356_v27, %v2284_v51  ;;  %v2548_v4 = vadd.f32 %v2356_v27, %v2288_v23 }
 0x19b   :  { %v2552_v26 = vadd.f32 %v2356_v27, %v2292_v31  ;;  %v2556_v62 = vadd.f32 %v2356_v27, %v2296_v45  ;;  %v2560_v44 = vadd.f32 %v2356_v27, %v2300_v6  ;;  %v2564_v51 = vadd.f32 %v2356_v27, %v2304_v19 }
 0x19c   :  { %v2568_v23 = vadd.f32 %v2356_v27, %v2308_v43  ;;  %v2572_v31 = vadd.f32 %v2356_v27, %v2312_v9  ;;  %v2576_v45 = vadd.f32 %v2356_v27, %v3041_v63  ;;  %v2580_v6 = vadd.f32 %v2356_v27, %v3043_v35 }
 0x19d   :  { %3038 = vst [vmem:[#allocation8_spill] sm:$0xff] %v2564_v51  ;;  %v2584_v19 = vadd.f32 %v2356_v27, %v3045_v55  ;;  %v3047_v51 = vld [vmem:[#allocation2_spill] sm:$0xff] }
 0x19e   :  { %3039 = vst [vmem:[#allocation13_spill] sm:$0xff] %v2568_v23  ;;  %3040 = vst [vmem:[#allocation12_spill] sm:$0xff] %v2572_v31  ;;  %v2588_v43 = vadd.f32 %v2356_v27, %v3047_v51  ;;  %v3048_v23 = vld [vmem:[#allocation5_spill] sm:$0xff]  ;;  %v3049_v31 = vld [vmem:[#allocation4_spill] sm:$0xff] }
 0x19f   :  { %3042 = vst [vmem:[#allocation15_spill] sm:$0xff] %v2576_v45  ;;  %3044 = vst [vmem:[#allocation17_spill] sm:$0xff] %v2580_v6  ;;  %v2592_v9 = vadd.f32 %v2356_v27, %v3048_v23  ;;  %v2596_v63 = vadd.f32 %v2356_v27, %v3049_v31  ;;  %v3050_v45 = vld [vmem:[#allocation7_spill] sm:$0xff]  ;;  %v3051_v6 = vld [vmem:[#allocation6_spill] sm:$0xff]  ;;  %v2612_v23 = vadd.f32 %v2356_v27, %v2352_v34  ;;  %v1137_v34 = vmax.f32 %v2380_v28, 0.0 }
 0x1a0   :  { %3046 = vst [vmem:[#allocation14_spill] sm:$0xff] %v2584_v19  ;;  %v2600_v35 = vadd.f32 %v2356_v27, %v3050_v45  ;;  %v2604_v55 = vadd.f32 %v2356_v27, %v3051_v6  ;;  %v3052_v19 = vld [vmem:[#allocation9_spill] sm:$0xff]  ;;  %v2616_v31 = vadd.f32 %v2356_v27, %v2360_v60  ;;  %v2620_v45 = vadd.f32 %v2356_v27, %v2364_v47 }
 0x1a1   :  { %v2608_v51 = vadd.f32 %v2356_v27, %v3052_v19  ;;  %3054 = vst [vmem:[#allocation19_spill] sm:$0xff] %v2612_v23  ;;  %v2624_v6 = vadd.f32 %v2356_v27, %v2368_v20  ;;  %v2628_v19 = vadd.f32 %v2356_v27, %v2372_v10  ;;  %v1138_v23 = vmax.f32 %v2384_v48, 0.0  ;;  %1201 = vst.msk [vmem:[%s2954_s4 + $0x8] sm:$0xff] %vm652_vm2, %v1137_v34 }
 0x1a2   :  { %3055 = vst [vmem:[#allocation21_spill] sm:$0xff] %v2616_v31  ;;  %3056 = vst [vmem:[#allocation18_spill] sm:$0xff] %v2620_v45  ;;  %v1139_v60 = vmax.f32 %v2388_v21, 0.0  ;;  %v1140_v31 = vmax.f32 %v2392_v12, 0.0  ;;  %v1141_v47 = vmax.f32 %v2396_v58, 0.0  ;;  %v1142_v45 = vmax.f32 %v2400_v52, 0.0 }
 0x1a3   :  { %3053 = vst [vmem:[#allocation16_spill] sm:$0xff] %v2608_v51  ;;  %3057 = vst [vmem:[#allocation20_spill] sm:$0xff] %v2624_v6  ;;  %v1136_v51 = vmax.f32 %v2376_v57, 0.0  ;;  %v1143_v20 = vmax.f32 %v2404_v49, 0.0  ;;  %v1144_v6 = vmax.f32 %v2408_v5, 0.0  ;;  %v1145_v27 = vmax.f32 %v2412_v16, 0.0 }
 0x1a4   :  { %v1146_v10 = vmax.f32 %v2416_v37, 0.0  ;;  %v1147_v57 = vmax.f32 %v2420_v40, 0.0  ;;  %1202 = vst.msk [vmem:[%s2954_s4 + $0x10] sm:$0xff] %vm652_vm2, %v1138_v23  ;;  %1203 = vst.msk [vmem:[%s2954_s4 + $0x18] sm:$0xff] %vm652_vm2, %v1139_v60  ;;  %v1148_v28 = vmax.f32 %v2424_v36, 0.0  ;;  %v1149_v48 = vmax.f32 %v2428_v38, 0.0 }
 0x1a5   :  { %1200 = vst.msk [vmem:[%s2954_s4] sm:$0xff] %vm652_vm2, %v1136_v51  ;;  %v1150_v21 = vmax.f32 %v2432_v54, 0.0  ;;  %v1151_v12 = vmax.f32 %v2436_v3, 0.0  ;;  %1204 = vst.msk [vmem:[%s2954_s4 + $0x20] sm:$0xff] %vm652_vm2, %v1140_v31  ;;  %v1152_v58 = vmax.f32 %v2440_v46, 0.0  ;;  %v1153_v52 = vmax.f32 %v2444_v61, 0.0 }
 0x1a6   :  { %1205 = vst.msk [vmem:[%s2954_s4 + $0x28] sm:$0xff] %vm652_vm2, %v1141_v47  ;;  %1206 = vst.msk [vmem:[%s2954_s4 + $0x30] sm:$0xff] %vm652_vm2, %v1142_v45  ;;  %v1154_v49 = vmax.f32 %v2448_v18, 0.0  ;;  %v1155_v5 = vmax.f32 %v2452_v30, 0.0  ;;  %v1156_v16 = vmax.f32 %v2456_v11, 0.0  ;;  %v1157_v37 = vmax.f32 %v2460_v25, 0.0 }
 0x1a7   :  { %1207 = vst.msk [vmem:[%s2954_s4 + $0x38] sm:$0xff] %vm652_vm2, %v1143_v20  ;;  %1208 = vst.msk [vmem:[%s2954_s4 + $0x40] sm:$0xff] %vm652_vm2, %v1144_v6  ;;  %v1158_v40 = vmax.f32 %v2464_v50, 0.0  ;;  %v1159_v36 = vmax.f32 %v2468_v2, 0.0  ;;  %v1160_v38 = vmax.f32 %v2472_v42, 0.0  ;;  %v1161_v54 = vmax.f32 %v2476_v59, 0.0 }
 0x1a8   :  { %1209 = vst.msk [vmem:[%s2954_s4 + $0x48] sm:$0xff] %vm652_vm2, %v1145_v27  ;;  %1210 = vst.msk [vmem:[%s2954_s4 + $0x50] sm:$0xff] %vm652_vm2, %v1146_v10  ;;  %v1162_v3 = vmax.f32 %v2480_v22, 0.0  ;;  %v1163_v46 = vmax.f32 %v2484_v41, 0.0  ;;  %v1164_v61 = vmax.f32 %v2488_v14, 0.0  ;;  %v1165_v18 = vmax.f32 %v2492_v32, 0.0 }
 0x1a9   :  { %1211 = vst.msk [vmem:[%s2954_s4 + $0x58] sm:$0xff] %vm652_vm2, %v1147_v57  ;;  %1212 = vst.msk [vmem:[%s2954_s4 + $0x60] sm:$0xff] %vm652_vm2, %v1148_v28  ;;  %v1166_v30 = vmax.f32 %v2496_v1, 0.0  ;;  %v1167_v11 = vmax.f32 %v2500_v24, 0.0  ;;  %v1168_v25 = vmax.f32 %v2504_v56, 0.0  ;;  %v1169_v50 = vmax.f32 %v2508_v15, 0.0 }
 0x1aa   :  { %1213 = vst.msk [vmem:[%s2954_s4 + $0x68] sm:$0xff] %vm652_vm2, %v1149_v48  ;;  %1214 = vst.msk [vmem:[%s2954_s4 + $0x70] sm:$0xff] %vm652_vm2, %v1150_v21  ;;  %v1170_v2 = vmax.f32 %v2512_v53, 0.0  ;;  %v1171_v42 = vmax.f32 %v2516_v17, 0.0  ;;  %v1172_v59 = vmax.f32 %v2520_v39, 0.0  ;;  %v1173_v22 = vmax.f32 %v2524_v8, 0.0 }
 0x1ab   :  { %1215 = vst.msk [vmem:[%s2954_s4 + $0x78] sm:$0xff] %vm652_vm2, %v1151_v12  ;;  %1216 = vst.msk [vmem:[%s2954_s4 + $0x80] sm:$0xff] %vm652_vm2, %v1152_v58  ;;  %v1174_v41 = vmax.f32 %v2528_v0, 0.0  ;;  %v1175_v14 = vmax.f32 %v2532_v33, 0.0  ;;  %v1176_v32 = vmax.f32 %v2536_v7, 0.0  ;;  %v1177_v1 = vmax.f32 %v2540_v13, 0.0 }
 0x1ac   :  { %1217 = vst.msk [vmem:[%s2954_s4 + $0x88] sm:$0xff] %vm652_vm2, %v1153_v52  ;;  %1218 = vst.msk [vmem:[%s2954_s4 + $0x90] sm:$0xff] %vm652_vm2, %v1154_v49  ;;  %v1178_v24 = vmax.f32 %v2544_v29, 0.0  ;;  %v1179_v56 = vmax.f32 %v2548_v4, 0.0  ;;  %v1180_v15 = vmax.f32 %v2552_v26, 0.0  ;;  %v1181_v53 = vmax.f32 %v2556_v62, 0.0 }
 0x1ad   :  { %1219 = vst.msk [vmem:[%s2954_s4 + $0x98] sm:$0xff] %vm652_vm2, %v1155_v5  ;;  %1220 = vst.msk [vmem:[%s2954_s4 + $0xa0] sm:$0xff] %vm652_vm2, %v1156_v16  ;;  %v1182_v17 = vmax.f32 %v2560_v44, 0.0  ;;  %v3058_v39 = vld [vmem:[#allocation8_spill] sm:$0xff]  ;;  %v3059_v0 = vld [vmem:[#allocation13_spill] sm:$0xff]  ;;  %v1189_v23 = vmax.f32 %v2588_v43, 0.0 }
 0x1ae   :  { %1221 = vst.msk [vmem:[%s2954_s4 + $0xa8] sm:$0xff] %vm652_vm2, %v1157_v37  ;;  %1222 = vst.msk [vmem:[%s2954_s4 + $0xb0] sm:$0xff] %vm652_vm2, %v1158_v40  ;;  %v1183_v8 = vmax.f32 %v3058_v39, 0.0  ;;  %v1184_v33 = vmax.f32 %v3059_v0, 0.0  ;;  %v3060_v7 = vld [vmem:[#allocation12_spill] sm:$0xff]  ;;  %v3061_v29 = vld [vmem:[#allocation15_spill] sm:$0xff] }
 0x1af   :  { %1223 = vst.msk [vmem:[%s2954_s4 + $0xb8] sm:$0xff] %vm652_vm2, %v1159_v36  ;;  %1224 = vst.msk [vmem:[%s2954_s4 + $0xc0] sm:$0xff] %vm652_vm2, %v1160_v38  ;;  %v1185_v13 = vmax.f32 %v3060_v7, 0.0  ;;  %v1186_v4 = vmax.f32 %v3061_v29, 0.0  ;;  %v3062_v26 = vld [vmem:[#allocation17_spill] sm:$0xff]  ;;  %v3063_v44 = vld [vmem:[#allocation14_spill] sm:$0xff] }
 0x1b0   :  { %1225 = vst.msk [vmem:[%s2954_s4 + $0xc8] sm:$0xff] %vm652_vm2, %v1161_v54  ;;  %1226 = vst.msk [vmem:[%s2954_s4 + $0xd0] sm:$0xff] %vm652_vm2, %v1162_v3  ;;  %v1187_v62 = vmax.f32 %v3062_v26, 0.0  ;;  %v1188_v51 = vmax.f32 %v3063_v44, 0.0  ;;  %v1190_v31 = vmax.f32 %v2592_v9, 0.0  ;;  %v1191_v45 = vmax.f32 %v2596_v63, 0.0 }
 0x1b1   :  { %1227 = vst.msk [vmem:[%s2954_s4 + $0xd8] sm:$0xff] %vm652_vm2, %v1163_v46  ;;  %1228 = vst.msk [vmem:[%s2954_s4 + $0xe0] sm:$0xff] %vm652_vm2, %v1164_v61  ;;  %v1192_v43 = vmax.f32 %v2600_v35, 0.0  ;;  %v1193_v9 = vmax.f32 %v2604_v55, 0.0  ;;  %v3064_v63 = vld [vmem:[#allocation16_spill] sm:$0xff]  ;;  %v3065_v34 = vld [vmem:[#allocation19_spill] sm:$0xff] }
 0x1b2   :  { %1229 = vst.msk [vmem:[%s2954_s4 + $0xe8] sm:$0xff] %vm652_vm2, %v1165_v18  ;;  %1230 = vst.msk [vmem:[%s2954_s4 + $0xf0] sm:$0xff] %vm652_vm2, %v1166_v30  ;;  %v1194_v6 = vmax.f32 %v3064_v63, 0.0  ;;  %v1195_v60 = vmax.f32 %v3065_v34, 0.0  ;;  %v3066_v35 = vld [vmem:[#allocation21_spill] sm:$0xff]  ;;  %v3067_v47 = vld [vmem:[#allocation18_spill] sm:$0xff] }
 0x1b3   :  { %1231 = vst.msk [vmem:[%s2954_s4 + $0xf8] sm:$0xff] %vm652_vm2, %v1167_v11  ;;  %1232 = vst.msk [vmem:[%s2954_s4 + $0x100] sm:$0xff] %vm652_vm2, %v1168_v25  ;;  %v1196_v55 = vmax.f32 %v3066_v35, 0.0  ;;  %v1197_v20 = vmax.f32 %v3067_v47, 0.0  ;;  %v3068_v27 = vld [vmem:[#allocation20_spill] sm:$0xff]  ;;  %v1199_v57 = vmax.f32 %v2628_v19, 0.0 }
 0x1b4   :  { %1233 = vst.msk [vmem:[%s2954_s4 + $0x108] sm:$0xff] %vm652_vm2, %v1169_v50  ;;  %1234 = vst.msk [vmem:[%s2954_s4 + $0x110] sm:$0xff] %vm652_vm2, %v1170_v2  ;;  %v1198_v10 = vmax.f32 %v3068_v27, 0.0 }
 0x1b5   :  { %1235 = vst.msk [vmem:[%s2954_s4 + $0x118] sm:$0xff] %vm652_vm2, %v1171_v42  ;;  %1236 = vst.msk [vmem:[%s2954_s4 + $0x120] sm:$0xff] %vm652_vm2, %v1172_v59 }
 0x1b6   :  { %1237 = vst.msk [vmem:[%s2954_s4 + $0x128] sm:$0xff] %vm652_vm2, %v1173_v22  ;;  %1238 = vst.msk [vmem:[%s2954_s4 + $0x130] sm:$0xff] %vm652_vm2, %v1174_v41 }
 0x1b7   :  { %1239 = vst.msk [vmem:[%s2954_s4 + $0x138] sm:$0xff] %vm652_vm2, %v1175_v14  ;;  %1240 = vst.msk [vmem:[%s2954_s4 + $0x140] sm:$0xff] %vm652_vm2, %v1176_v32 }
 0x1b8   :  { %1241 = vst.msk [vmem:[%s2954_s4 + $0x148] sm:$0xff] %vm652_vm2, %v1177_v1  ;;  %1242 = vst.msk [vmem:[%s2954_s4 + $0x150] sm:$0xff] %vm652_vm2, %v1178_v24 }
 0x1b9   :  { %1243 = vst.msk [vmem:[%s2954_s4 + $0x158] sm:$0xff] %vm652_vm2, %v1179_v56  ;;  %1244 = vst.msk [vmem:[%s2954_s4 + $0x160] sm:$0xff] %vm652_vm2, %v1180_v15 }
 0x1ba   :  { %1245 = vst.msk [vmem:[%s2954_s4 + $0x168] sm:$0xff] %vm652_vm2, %v1181_v53  ;;  %1246 = vst.msk [vmem:[%s2954_s4 + $0x170] sm:$0xff] %vm652_vm2, %v1182_v17 }
 0x1bb   :  { %1247 = vst.msk [vmem:[%s2954_s4 + $0x178] sm:$0xff] %vm652_vm2, %v1183_v8  ;;  %1248 = vst.msk [vmem:[%s2954_s4 + $0x180] sm:$0xff] %vm652_vm2, %v1184_v33 }
 0x1bc   :  { %1249 = vst.msk [vmem:[%s2954_s4 + $0x188] sm:$0xff] %vm652_vm2, %v1185_v13  ;;  %1250 = vst.msk [vmem:[%s2954_s4 + $0x190] sm:$0xff] %vm652_vm2, %v1186_v4 }
 0x1bd   :  { %1251 = vst.msk [vmem:[%s2954_s4 + $0x198] sm:$0xff] %vm652_vm2, %v1187_v62  ;;  %1252 = vst.msk [vmem:[%s2954_s4 + $0x1a0] sm:$0xff] %vm652_vm2, %v1188_v51 }
 0x1be   :  { %1253 = vst.msk [vmem:[%s2954_s4 + $0x1a8] sm:$0xff] %vm652_vm2, %v1189_v23  ;;  %1254 = vst.msk [vmem:[%s2954_s4 + $0x1b0] sm:$0xff] %vm652_vm2, %v1190_v31 }
 0x1bf   :  { %1255 = vst.msk [vmem:[%s2954_s4 + $0x1b8] sm:$0xff] %vm652_vm2, %v1191_v45  ;;  %1256 = vst.msk [vmem:[%s2954_s4 + $0x1c0] sm:$0xff] %vm652_vm2, %v1192_v43 }
 0x1c0   :  { %1257 = vst.msk [vmem:[%s2954_s4 + $0x1c8] sm:$0xff] %vm652_vm2, %v1193_v9  ;;  %1258 = vst.msk [vmem:[%s2954_s4 + $0x1d0] sm:$0xff] %vm652_vm2, %v1194_v6 }
 0x1c1   :  { %1259 = vst.msk [vmem:[%s2954_s4 + $0x1d8] sm:$0xff] %vm652_vm2, %v1195_v60  ;;  %1260 = vst.msk [vmem:[%s2954_s4 + $0x1e0] sm:$0xff] %vm652_vm2, %v1196_v55 }
 0x1c2   :  { %1261 = vst.msk [vmem:[%s2954_s4 + $0x1e8] sm:$0xff] %vm652_vm2, %v1197_v20  ;;  %1262 = vst.msk [vmem:[%s2954_s4 + $0x1f0] sm:$0xff] %vm652_vm2, %v1198_v10 }
 0x1c3   :  { %1263 = vst.msk [vmem:[%s2954_s4 + $0x1f8] sm:$0xff] %vm652_vm2, %v1199_v57 }

</bundles_post_ra>
